<compile_context>
chip_gen: v5e
topology: v5e:2x2
jax: 0.10.0
libtpu: 0.0.40
codegen_flags: <defaults>
</compile_context>

<pallas_src>
import functools

import jax
import jax.numpy as jnp
from jax.experimental import pallas as pl
from jax.experimental.pallas import tpu as pltpu


def _downsizing_kernel(planes_ref, w1_ref, b1_ref, w2_ref, b2_ref, mask_ref,
                       out_ref, *, wq, nb, lseg, ho, wo):
    # planes_ref: (4, Cin, nb*lseg)  -- 4 parity planes, nb batch segments folded in lanes
    # w1_ref:     (Cout, 9*Cin)      -- tap-folded conv1 weights (tap-major, channel-minor)
    # b1_ref:     (Cout, 1)
    # w2_ref:     (Cout, 9*Cout)     -- tap-folded conv2 weights
    # b2_ref:     (Cout, 1)
    # mask_ref:   (1, l1)            -- 1.0 at valid conv1-output lanes, 0.0 at halo/junk
    # out_ref:    (Cout, nb*ho*wo)   -- compact conv2 output (lane-dense store)
    lp = nb * lseg                   # lanes of the phase-plane block
    l1 = lp - (wq + 1)               # conv1 accumulator / y lanes
    l2 = l1 - (2 * wq + 2)           # conv2 accumulator lanes

    planes = [planes_ref[p] for p in range(4)]               # 4 x (Cin, lp)

    # ---- conv1: k=3, s=2, p=1 -- fold 9 taps into the contraction dim ------
    taps1 = []
    for kh in range(3):
        for kw in range(3):
            p = (kh % 2) * 2 + (kw % 2)                      # parity plane
            s1 = (kh // 2) * wq + (kw // 2)                  # static flat shift
            taps1.append(planes[p][:, s1:s1 + l1])           # (Cin, l1)
    x1 = jnp.concatenate(taps1, axis=0)                      # (9*Cin, l1)
    acc1 = jnp.dot(w1_ref[...], x1, preferred_element_type=jnp.float32)
    acc1 = acc1 + b1_ref[...]
    # LeakyReLU(0.2) then zero the halo/junk lanes: y is the zero-padded conv1
    # output in flat (pitch wq) layout, kept entirely in VMEM.
    y = jnp.where(acc1 >= 0, acc1, 0.2 * acc1) * mask_ref[...]

    # ---- conv2: k=3, s=1, p=1 -- same tap folding ---------------------------
    taps2 = []
    for kh in range(3):
        for kw in range(3):
            s2 = kh * wq + kw                                # static flat shift
            taps2.append(y[:, s2:s2 + l2])                   # (Cout, l2)
    x2 = jnp.concatenate(taps2, axis=0)                      # (9*Cout, l2)
    acc2 = jnp.dot(w2_ref[...], x2, preferred_element_type=jnp.float32)
    acc2 = acc2 + b2_ref[...]
    o = jnp.where(acc2 >= 0, acc2, 0.2 * acc2)

    # ---- compact extraction in VMEM -> single lane-dense store --------------
    rows = []
    for b in range(nb):
        for r in range(ho):
            base = b * lseg + r * wq
            rows.append(o[:, base:base + wo])                # (Cout, wo)
    out_ref[...] = jnp.concatenate(rows, axis=1).astype(out_ref.dtype)


def downsizing_block(x_nchw, params):
    """Forward pass equivalent to the PyTorch DownsizingBlock."""
    w1, b1, w2, b2 = params            # w: (Cout, Cin, 3, 3), b: (Cout,)
    N, Cin, H, W = x_nchw.shape
    Cout = w1.shape[0]
    f32 = jnp.float32

    Ho = (H - 1) // 2 + 1              # conv1 output spatial (= conv2 output)
    Wo = (W - 1) // 2 + 1
    Wq = Wo + 2                        # row pitch (1 zero col each side)
    Hq = Ho + 1                        # parity-plane rows needed
    Lseg = (Ho + 3) * Wq + 1           # per-batch flat plane segment length

    # Batch tile: fold NB images into the lane axis so the output store / MXU
    # N-dim is >=128 lanes and the serial grid is short on v5e/v6e.
    pix = Ho * Wo
    NB = 1
    if pix < 128:
        NB = N
        for cand in range(1, N + 1):
            if N % cand == 0 and cand * pix >= 128:
                NB = cand
                break
    NT = N // NB

    # ---- 4 parity phase planes of the padded input (single pad+reshape+transpose)
    xp = jnp.pad(x_nchw.astype(f32),
                 ((0, 0), (0, 0), (1, 2 * Hq - H - 1), (1, 2 * Wq - W - 1)))
    ph = xp.reshape(NT, NB, Cin, Hq, 2, Wq, 2)
    ph = ph.transpose(0, 4, 6, 2, 1, 3, 5)          # (NT, 2, 2, Cin, NB, Hq, Wq)
    ph = ph.reshape(NT, 4, Cin, NB, Hq * Wq)
    ph = jnp.pad(ph, ((0, 0),) * 4 + ((Wq + 1, Wq),))   # per-batch zero margins
    planes = ph.reshape(NT, 4, Cin, NB * Lseg)

    # ---- tap-folded weights (tap t = kh*3 + kw major, channel minor) --------
    w1f = jnp.transpose(w1.astype(f32), (0, 2, 3, 1)).reshape(Cout, 9 * Cin)
    w2f = jnp.transpose(w2.astype(f32), (0, 2, 3, 1)).reshape(Cout, 9 * Cout)
    b1c = b1.astype(f32).reshape(Cout, 1)
    b2c = b2.astype(f32).reshape(Cout, 1)

    # ---- validity mask over conv1/y lanes (zeros at border + junk lanes) ----
    L1 = NB * Lseg - (Wq + 1)
    L2 = L1 - (2 * Wq + 2)
    a = jnp.arange(L1)
    u = a % Lseg
    rr = u // Wq
    cc = u % Wq
    mask = ((rr >= 1) & (rr <= Ho) & (cc >= 1) & (cc <= Wo))
    mask = mask.astype(f32).reshape(1, L1)

    kernel = functools.partial(_downsizing_kernel, wq=Wq, nb=NB, lseg=Lseg,
                               ho=Ho, wo=Wo)

    out_lanes = NB * Ho * Wo
    flops = 2 * NT * Cout * 9 * (Cin * L1 + Cout * L2)
    bytes_accessed = 4 * (planes.size + w1f.size + w2f.size + b1c.size
                          + b2c.size + mask.size + NT * Cout * out_lanes)

    out = pl.pallas_call(
        kernel,
        out_shape=jax.ShapeDtypeStruct((NT, Cout, out_lanes), f32),
        grid=(NT,),
        in_specs=[
            pl.BlockSpec((None, 4, Cin, NB * Lseg), lambda i: (i, 0, 0, 0)),
            pl.BlockSpec((Cout, 9 * Cin), lambda i: (0, 0)),
            pl.BlockSpec((Cout, 1), lambda i: (0, 0)),
            pl.BlockSpec((Cout, 9 * Cout), lambda i: (0, 0)),
            pl.BlockSpec((Cout, 1), lambda i: (0, 0)),
            pl.BlockSpec((1, L1), lambda i: (0, 0)),
        ],
        out_specs=pl.BlockSpec((None, Cout, out_lanes), lambda i: (i, 0, 0)),
        compiler_params=pltpu.CompilerParams(
            dimension_semantics=("parallel",),
            vmem_limit_bytes=48 * 1024 * 1024),
        cost_estimate=pl.CostEstimate(flops=flops, transcendentals=0,
                                      bytes_accessed=bytes_accessed),
    )(planes, w1f, b1c, w2f, b2c, mask)

    # (NT, Cout, NB*Ho*Wo) -> (N, Cout, Ho, Wo); the transpose is a no-op when NB == 1.
    out = out.reshape(NT, Cout, NB, Ho, Wo).transpose(0, 2, 1, 3, 4)
    return out.reshape(N, Cout, Ho, Wo)


def _reference(x_nchw, params):
    """Pure-JAX reference using lax.conv_general_dilated (NCHW, OIHW)."""
    w1, b1, w2, b2 = params

    def conv(x, w, b, stride):
        y = jax.lax.conv_general_dilated(
            x, w, window_strides=(stride, stride), padding=((1, 1), (1, 1)),
            dimension_numbers=("NCHW", "OIHW", "NCHW"))
        y = y + b[None, :, None, None]
        return jnp.where(y >= 0, y, 0.2 * y)

    return conv(conv(x_nchw, w1, b1, 2), w2, b2, 1)


if __name__ == "__main__":
    in_channels, out_channels = 4, 8
    N, H, W = 2, 16, 16

    key = jax.random.PRNGKey(0)
    kx, kw1, kb1, kw2, kb2 = jax.random.split(key, 5)

    x = jax.random.normal(kx, (N, in_channels, H, W), dtype=jnp.float32)
    w1 = jax.random.normal(kw1, (out_channels, in_channels, 3, 3), jnp.float32) * 0.1
    b1 = jax.random.normal(kb1, (out_channels,), jnp.float32) * 0.1
    w2 = jax.random.normal(kw2, (out_channels, out_channels, 3, 3), jnp.float32) * 0.1
    b2 = jax.random.normal(kb2, (out_channels,), jnp.float32) * 0.1
    params = (w1, b1, w2, b2)

    out = jax.jit(downsizing_block)(x, params)
    out = jax.block_until_ready(out)

    ref = _reference(x, params)
    assert out.shape == (N, out_channels, H // 2, W // 2), out.shape
    assert jnp.allclose(out, ref, atol=1e-4, rtol=1e-4), "mismatch vs reference"

    print("KERNEL_OK")
</pallas_src>

<mosaic_0001>
module attributes {stable_mosaic.version = 11 : i64} {
  func.func @_downsizing_kernel(%arg0: i32, %arg1: memref<1x4x4x222xf32, #tpu.memory_space<vmem>>, %arg2: memref<8x36xf32, #tpu.memory_space<vmem>>, %arg3: memref<8x1xf32, #tpu.memory_space<vmem>>, %arg4: memref<8x72xf32, #tpu.memory_space<vmem>>, %arg5: memref<8x1xf32, #tpu.memory_space<vmem>>, %arg6: memref<1x211xf32, #tpu.memory_space<vmem>>, %arg7: memref<1x8x128xf32, #tpu.memory_space<vmem>>) attributes {dimension_semantics = [#tpu.dimension_semantics<parallel>], iteration_bounds = array<i64: 1>, scalar_prefetch = 0 : i64, scratch_operands = 0 : i64, tpu.core_type = #tpu.core_type<tc>, window_params = [{transform_indices = @transform_0, window_bounds = array<i64: 1, 4, 4, 222>}, {pipeline_mode = #tpu.pipeline_mode<synchronous>, transform_indices = @transform_1, window_bounds = array<i64: 8, 36>}, {pipeline_mode = #tpu.pipeline_mode<synchronous>, transform_indices = @transform_2, window_bounds = array<i64: 8, 1>}, {pipeline_mode = #tpu.pipeline_mode<synchronous>, transform_indices = @transform_3, window_bounds = array<i64: 8, 72>}, {pipeline_mode = #tpu.pipeline_mode<synchronous>, transform_indices = @transform_4, window_bounds = array<i64: 8, 1>}, {pipeline_mode = #tpu.pipeline_mode<synchronous>, transform_indices = @transform_5, window_bounds = array<i64: 1, 211>}, {transform_indices = @transform_6, window_bounds = array<i64: 1, 8, 128>}]} {
    %c0 = arith.constant 0 : index
    %c0_0 = arith.constant 0 : index
    %c0_1 = arith.constant 0 : index
    %c0_2 = arith.constant 0 : index
    %0 = vector.load %arg1[%c0, %c0_0, %c0_1, %c0_2] : memref<1x4x4x222xf32, #tpu.memory_space<vmem>>, vector<1x1x4x222xf32>
    %1 = vector.shape_cast %0 : vector<1x1x4x222xf32> to vector<4x222xf32>
    %c0_3 = arith.constant 0 : index
    %c1 = arith.constant 1 : index
    %c0_4 = arith.constant 0 : index
    %c0_5 = arith.constant 0 : index
    %2 = vector.load %arg1[%c0_3, %c1, %c0_4, %c0_5] : memref<1x4x4x222xf32, #tpu.memory_space<vmem>>, vector<1x1x4x222xf32>
    %3 = vector.shape_cast %2 : vector<1x1x4x222xf32> to vector<4x222xf32>
    %c0_6 = arith.constant 0 : index
    %c2 = arith.constant 2 : index
    %c0_7 = arith.constant 0 : index
    %c0_8 = arith.constant 0 : index
    %4 = vector.load %arg1[%c0_6, %c2, %c0_7, %c0_8] : memref<1x4x4x222xf32, #tpu.memory_space<vmem>>, vector<1x1x4x222xf32>
    %5 = vector.shape_cast %4 : vector<1x1x4x222xf32> to vector<4x222xf32>
    %c0_9 = arith.constant 0 : index
    %c3 = arith.constant 3 : index
    %c0_10 = arith.constant 0 : index
    %c0_11 = arith.constant 0 : index
    %6 = vector.load %arg1[%c0_9, %c3, %c0_10, %c0_11] : memref<1x4x4x222xf32, #tpu.memory_space<vmem>>, vector<1x1x4x222xf32>
    %7 = vector.shape_cast %6 : vector<1x1x4x222xf32> to vector<4x222xf32>
    %8 = vector.extract_strided_slice %1 {offsets = [0, 0], sizes = [4, 211], strides = [1, 1]} : vector<4x222xf32> to vector<4x211xf32>
    %9 = vector.extract_strided_slice %3 {offsets = [0, 0], sizes = [4, 211], strides = [1, 1]} : vector<4x222xf32> to vector<4x211xf32>
    %10 = vector.extract_strided_slice %1 {offsets = [0, 1], sizes = [4, 211], strides = [1, 1]} : vector<4x222xf32> to vector<4x211xf32>
    %11 = vector.extract_strided_slice %5 {offsets = [0, 0], sizes = [4, 211], strides = [1, 1]} : vector<4x222xf32> to vector<4x211xf32>
    %12 = vector.extract_strided_slice %7 {offsets = [0, 0], sizes = [4, 211], strides = [1, 1]} : vector<4x222xf32> to vector<4x211xf32>
    %13 = vector.extract_strided_slice %5 {offsets = [0, 1], sizes = [4, 211], strides = [1, 1]} : vector<4x222xf32> to vector<4x211xf32>
    %14 = vector.extract_strided_slice %1 {offsets = [0, 10], sizes = [4, 211], strides = [1, 1]} : vector<4x222xf32> to vector<4x211xf32>
    %15 = vector.extract_strided_slice %3 {offsets = [0, 10], sizes = [4, 211], strides = [1, 1]} : vector<4x222xf32> to vector<4x211xf32>
    %16 = vector.extract_strided_slice %1 {offsets = [0, 11], sizes = [4, 211], strides = [1, 1]} : vector<4x222xf32> to vector<4x211xf32>
    %17 = tpu.concatenate %8, %9, %10, %11, %12, %13, %14, %15, %16 in 0 : vector<4x211xf32>, vector<4x211xf32>, vector<4x211xf32>, vector<4x211xf32>, vector<4x211xf32>, vector<4x211xf32>, vector<4x211xf32>, vector<4x211xf32>, vector<4x211xf32> -> vector<36x211xf32>
    %c0_12 = arith.constant 0 : index
    %c0_13 = arith.constant 0 : index
    %18 = vector.load %arg2[%c0_12, %c0_13] : memref<8x36xf32, #tpu.memory_space<vmem>>, vector<8x36xf32>
    %cst = arith.constant dense<0.000000e+00> : vector<8x211xf32>
    %19 = tpu.matmul %18, %17, %cst {dimension_numbers = #tpu.dot_dimension_numbers<[1], [0], [0], [1], [0, 0, 1, 1], [], []>} : vector<8x36xf32>, vector<36x211xf32>, vector<8x211xf32> -> vector<8x211xf32>
    %c0_14 = arith.constant 0 : index
    %c0_15 = arith.constant 0 : index
    %20 = vector.load %arg3[%c0_14, %c0_15] : memref<8x1xf32, #tpu.memory_space<vmem>>, vector<8x1xf32>
    %21 = vector.broadcast %20 : vector<8x1xf32> to vector<8x211xf32>
    %22 = arith.addf %19, %21 : vector<8x211xf32>
    %cst_16 = arith.constant 0.000000e+00 : f32
    %23 = vector.broadcast %cst_16 : f32 to vector<8x211xf32>
    %24 = arith.cmpf oge, %22, %23 : vector<8x211xf32>
    %cst_17 = arith.constant 2.000000e-01 : f32
    %25 = vector.broadcast %cst_17 : f32 to vector<8x211xf32>
    %26 = arith.mulf %25, %22 : vector<8x211xf32>
    %27 = arith.select %24, %22, %26 : vector<8x211xi1>, vector<8x211xf32>
    %c0_18 = arith.constant 0 : index
    %c0_19 = arith.constant 0 : index
    %28 = vector.load %arg6[%c0_18, %c0_19] : memref<1x211xf32, #tpu.memory_space<vmem>>, vector<1x211xf32>
    %29 = vector.broadcast %28 : vector<1x211xf32> to vector<8x211xf32>
    %30 = arith.mulf %27, %29 : vector<8x211xf32>
    %31 = vector.extract_strided_slice %30 {offsets = [0, 0], sizes = [8, 189], strides = [1, 1]} : vector<8x211xf32> to vector<8x189xf32>
    %32 = vector.extract_strided_slice %30 {offsets = [0, 1], sizes = [8, 189], strides = [1, 1]} : vector<8x211xf32> to vector<8x189xf32>
    %33 = vector.extract_strided_slice %30 {offsets = [0, 2], sizes = [8, 189], strides = [1, 1]} : vector<8x211xf32> to vector<8x189xf32>
    %34 = vector.extract_strided_slice %30 {offsets = [0, 10], sizes = [8, 189], strides = [1, 1]} : vector<8x211xf32> to vector<8x189xf32>
    %35 = vector.extract_strided_slice %30 {offsets = [0, 11], sizes = [8, 189], strides = [1, 1]} : vector<8x211xf32> to vector<8x189xf32>
    %36 = vector.extract_strided_slice %30 {offsets = [0, 12], sizes = [8, 189], strides = [1, 1]} : vector<8x211xf32> to vector<8x189xf32>
    %37 = vector.extract_strided_slice %30 {offsets = [0, 20], sizes = [8, 189], strides = [1, 1]} : vector<8x211xf32> to vector<8x189xf32>
    %38 = vector.extract_strided_slice %30 {offsets = [0, 21], sizes = [8, 189], strides = [1, 1]} : vector<8x211xf32> to vector<8x189xf32>
    %39 = vector.extract_strided_slice %30 {offsets = [0, 22], sizes = [8, 189], strides = [1, 1]} : vector<8x211xf32> to vector<8x189xf32>
    %40 = tpu.concatenate %31, %32, %33, %34, %35, %36, %37, %38, %39 in 0 : vector<8x189xf32>, vector<8x189xf32>, vector<8x189xf32>, vector<8x189xf32>, vector<8x189xf32>, vector<8x189xf32>, vector<8x189xf32>, vector<8x189xf32>, vector<8x189xf32> -> vector<72x189xf32>
    %c0_20 = arith.constant 0 : index
    %c0_21 = arith.constant 0 : index
    %41 = vector.load %arg4[%c0_20, %c0_21] : memref<8x72xf32, #tpu.memory_space<vmem>>, vector<8x72xf32>
    %cst_22 = arith.constant dense<0.000000e+00> : vector<8x189xf32>
    %42 = tpu.matmul %41, %40, %cst_22 {dimension_numbers = #tpu.dot_dimension_numbers<[1], [0], [0], [1], [0, 0, 1, 1], [], []>} : vector<8x72xf32>, vector<72x189xf32>, vector<8x189xf32> -> vector<8x189xf32>
    %c0_23 = arith.constant 0 : index
    %c0_24 = arith.constant 0 : index
    %43 = vector.load %arg5[%c0_23, %c0_24] : memref<8x1xf32, #tpu.memory_space<vmem>>, vector<8x1xf32>
    %44 = vector.broadcast %43 : vector<8x1xf32> to vector<8x189xf32>
    %45 = arith.addf %42, %44 : vector<8x189xf32>
    %cst_25 = arith.constant 0.000000e+00 : f32
    %46 = vector.broadcast %cst_25 : f32 to vector<8x189xf32>
    %47 = arith.cmpf oge, %45, %46 : vector<8x189xf32>
    %cst_26 = arith.constant 2.000000e-01 : f32
    %48 = vector.broadcast %cst_26 : f32 to vector<8x189xf32>
    %49 = arith.mulf %48, %45 : vector<8x189xf32>
    %50 = arith.select %47, %45, %49 : vector<8x189xi1>, vector<8x189xf32>
    %51 = vector.extract_strided_slice %50 {offsets = [0, 0], sizes = [8, 8], strides = [1, 1]} : vector<8x189xf32> to vector<8x8xf32>
    %52 = vector.extract_strided_slice %50 {offsets = [0, 10], sizes = [8, 8], strides = [1, 1]} : vector<8x189xf32> to vector<8x8xf32>
    %53 = vector.extract_strided_slice %50 {offsets = [0, 20], sizes = [8, 8], strides = [1, 1]} : vector<8x189xf32> to vector<8x8xf32>
    %54 = vector.extract_strided_slice %50 {offsets = [0, 30], sizes = [8, 8], strides = [1, 1]} : vector<8x189xf32> to vector<8x8xf32>
    %55 = vector.extract_strided_slice %50 {offsets = [0, 40], sizes = [8, 8], strides = [1, 1]} : vector<8x189xf32> to vector<8x8xf32>
    %56 = vector.extract_strided_slice %50 {offsets = [0, 50], sizes = [8, 8], strides = [1, 1]} : vector<8x189xf32> to vector<8x8xf32>
    %57 = vector.extract_strided_slice %50 {offsets = [0, 60], sizes = [8, 8], strides = [1, 1]} : vector<8x189xf32> to vector<8x8xf32>
    %58 = vector.extract_strided_slice %50 {offsets = [0, 70], sizes = [8, 8], strides = [1, 1]} : vector<8x189xf32> to vector<8x8xf32>
    %59 = vector.extract_strided_slice %50 {offsets = [0, 111], sizes = [8, 8], strides = [1, 1]} : vector<8x189xf32> to vector<8x8xf32>
    %60 = vector.extract_strided_slice %50 {offsets = [0, 121], sizes = [8, 8], strides = [1, 1]} : vector<8x189xf32> to vector<8x8xf32>
    %61 = vector.extract_strided_slice %50 {offsets = [0, 131], sizes = [8, 8], strides = [1, 1]} : vector<8x189xf32> to vector<8x8xf32>
    %62 = vector.extract_strided_slice %50 {offsets = [0, 141], sizes = [8, 8], strides = [1, 1]} : vector<8x189xf32> to vector<8x8xf32>
    %63 = vector.extract_strided_slice %50 {offsets = [0, 151], sizes = [8, 8], strides = [1, 1]} : vector<8x189xf32> to vector<8x8xf32>
    %64 = vector.extract_strided_slice %50 {offsets = [0, 161], sizes = [8, 8], strides = [1, 1]} : vector<8x189xf32> to vector<8x8xf32>
    %65 = vector.extract_strided_slice %50 {offsets = [0, 171], sizes = [8, 8], strides = [1, 1]} : vector<8x189xf32> to vector<8x8xf32>
    %66 = vector.extract_strided_slice %50 {offsets = [0, 181], sizes = [8, 8], strides = [1, 1]} : vector<8x189xf32> to vector<8x8xf32>
    %67 = tpu.concatenate %51, %52, %53, %54, %55, %56, %57, %58, %59, %60, %61, %62, %63, %64, %65, %66 in 1 : vector<8x8xf32>, vector<8x8xf32>, vector<8x8xf32>, vector<8x8xf32>, vector<8x8xf32>, vector<8x8xf32>, vector<8x8xf32>, vector<8x8xf32>, vector<8x8xf32>, vector<8x8xf32>, vector<8x8xf32>, vector<8x8xf32>, vector<8x8xf32>, vector<8x8xf32>, vector<8x8xf32>, vector<8x8xf32> -> vector<8x128xf32>
    %c0_27 = arith.constant 0 : index
    %c0_28 = arith.constant 0 : index
    %c0_29 = arith.constant 0 : index
    %68 = vector.load %arg7[%c0_27, %c0_28, %c0_29] : memref<1x8x128xf32, #tpu.memory_space<vmem>>, vector<1x8x128xf32>
    %69 = vector.shape_cast %68 : vector<1x8x128xf32> to vector<8x128xf32>
    %70 = vector.shape_cast %67 : vector<8x128xf32> to vector<1x8x128xf32>
    tpu.vector_store %arg7[%c0_27, %c0_28, %c0_29], %70 {strides = array<i32>} : memref<1x8x128xf32, #tpu.memory_space<vmem>>, vector<1x8x128xf32>,
    return
  }
  func.func @transform_0(%arg0: i32) -> (i32, i32, i32, i32) {
    %c0_i32 = arith.constant 0 : i32
    %c0_i32_0 = arith.constant 0 : i32
    %c0_i32_1 = arith.constant 0 : i32
    %c0_i32_2 = arith.constant 0 : i32
    return %arg0, %c0_i32, %c0_i32_0, %c0_i32_1 : i32, i32, i32, i32
  }
  func.func @transform_1(%arg0: i32) -> (i32, i32) {
    %c0_i32 = arith.constant 0 : i32
    %c0_i32_0 = arith.constant 0 : i32
    %c0_i32_1 = arith.constant 0 : i32
    return %c0_i32, %c0_i32_0 : i32, i32
  }
  func.func @transform_2(%arg0: i32) -> (i32, i32) {
    %c0_i32 = arith.constant 0 : i32
    %c0_i32_0 = arith.constant 0 : i32
    %c0_i32_1 = arith.constant 0 : i32
    return %c0_i32, %c0_i32_0 : i32, i32
  }
  func.func @transform_3(%arg0: i32) -> (i32, i32) {
    %c0_i32 = arith.constant 0 : i32
    %c0_i32_0 = arith.constant 0 : i32
    %c0_i32_1 = arith.constant 0 : i32
    return %c0_i32, %c0_i32_0 : i32, i32
  }
  func.func @transform_4(%arg0: i32) -> (i32, i32) {
    %c0_i32 = arith.constant 0 : i32
    %c0_i32_0 = arith.constant 0 : i32
    %c0_i32_1 = arith.constant 0 : i32
    return %c0_i32, %c0_i32_0 : i32, i32
  }
  func.func @transform_5(%arg0: i32) -> (i32, i32) {
    %c0_i32 = arith.constant 0 : i32
    %c0_i32_0 = arith.constant 0 : i32
    %c0_i32_1 = arith.constant 0 : i32
    return %c0_i32, %c0_i32_0 : i32, i32
  }
  func.func @transform_6(%arg0: i32) -> (i32, i32, i32) {
    %c0_i32 = arith.constant 0 : i32
    %c0_i32_0 = arith.constant 0 : i32
    %c0_i32_1 = arith.constant 0 : i32
    return %arg0, %c0_i32, %c0_i32_0 : i32, i32, i32
  }
}

</mosaic_0001>

<bundles_post_ra>
// kernel: downsizing_block.1
= control target key start
LH: loop header
LB: loop body
LE: loop exit
PB: predicated region body
PF: predicated region fallthrough
CT: control target
= control target key end

     0   :  { %s484_s29 = smov 127   ;;  %s486_s30 = smov 117   ;;  %v487_v27 = vmov 0   ;;  %vm85_vm0 = vcmask 965632   ;;  %vm107_vm1 = vcmask 957440   ;;  %vm109_vm2 = vcmask 1043456   ;;  %s634_s0 = inlined_call_operand.vmem [shape: f32[1,4,4,222], index: 0, kind: input, shape index: {}]   ;;  %s635_s2 = inlined_call_operand.vmem [shape: f32[8,1], index: 2, kind: input, shape index: {}]   ;;  %s636_s1 = inlined_call_operand.vmem [shape: f32[8,36], index: 1, kind: input, shape index: {}]   ;;  %s637_s5 = inlined_call_operand.vmem [shape: f32[1,211], index: 5, kind: input, shape index: {}]   ;;  %s638_s4 = inlined_call_operand.vmem [shape: f32[8,1], index: 4, kind: input, shape index: {}]   ;;  %s639_s3 = inlined_call_operand.vmem [shape: f32[8,72], index: 3, kind: input, shape index: {}]   ;;  %s640_s6 = inlined_call_operand.vmem [shape: f32[1,8,128], index: 6, kind: output, shape index: {}]  }
   0x1   :  { %v23_v0 = vld [vmem:[%s634_s0] sm:$0xff]  ;;  %v392_v1 = vld [vmem:[%s634_s0 + $0x8] sm:$0xff]  ;;  %v393_v6 = vld [vmem:[%s634_s0 + $0x10] sm:$0xff]  ;;  %442 = vset.pattern.permute.xlu0 %v487_v27  ;;  %483 = vset.pattern.permute.xlu1 %v487_v27  ;;  %vm50_vm3 = vcmask 1039360   ;;  %vm125_vm4 = vcmask 293888   ;;  %s490_s12 = smov 116  }
   0x2   :  { %31 = vst [vmem:[#allocation1] ss:$2 sm:$0xff] %v23_v0  ;;  %v394_v9 = vld [vmem:[%s634_s0 + $0x18] sm:$0xff]  ;;  %s485_s0 = smov 118   ;;  %v119_v26 = vld [vmem:[%s635_s2] sm:$0xff]  ;;  %s491_s13 = smov 108  }
   0x3   :  { %v118_v55 = vld [vmem:[%s636_s1] sm:$0xff]  ;;  %s488_s1 = smov 107   ;;  %s492_s14 = smov 126   ;;  %vm246_vm7 = vcmask 867328   ;;  %vm238_vm8 = vcmask 875520   ;;  %vm230_vm9 = vcmask 883712  }
   0x4   :  { %v179_v57 = vld [vmem:[%s637_s5] sm:$0x3]  ;;  %s489_s5 = smov 106   ;;  %vm222_vm10 = vcmask 949248   ;;  %vm200_vm11 = vcmask 1031168   ;;  %vm257_vm12 = vcmask 588800  }
   0x5   :  { %v182_v61 = vperm.slane %v179_v57, 1  ;;  %s493_s18 = smov 75   ;;  %s495_s19 = smov 79   ;;  %vm358_vm15 = vcmask 64512  }
   0x6   :  { %s496_s20 = smov 122   ;;  %s497_s21 = smov 124  }
   0x7   :  { %s498_s22 = smov 73   ;;  %s499_s23 = smov 81  }
   0x8   :  { %s500_s24 = smov 120   ;;  %s501_s25 = smov 69  }
   0x9   :  { %v546_v2 = vld.sshfl [vmem:[#allocation1] sm:$0xff pattern:$0x75316420]  ;;  %v548_v3 = vld.sshfl [vmem:[#allocation1 + $0x8] sm:$0xff pattern:$0x75316420] }
   0xa   :  { %38 = vst [vmem:[#allocation1 + $0x1] ss:$2 sm:$0xff] %v392_v1  ;;  %s502_s26 = smov 71   ;;  %s503_s27 = smov 114  }
   0xb   :  { %s504_s28 = smov 67  }
  0x11   :  { %v550_v4 = vld.sshfl [vmem:[#allocation1] sm:$0xff pattern:$0x75316420]  ;;  %v552_v5 = vld.sshfl [vmem:[#allocation1 + $0x8] sm:$0xff pattern:$0x75316420] }
  0x12   :  { %43 = vst [vmem:[#allocation1] ss:$2 sm:$0xff] %v23_v0  ;;  %v111_v53 = vsel %vm109_vm2, %v548_v3, %v552_v5  ;;  %v110_v54 = vsel %vm109_vm2, %v546_v2, %v550_v4 }
  0x19   :  { %v44_v7 = vld.sshfl [vmem:[#allocation1] sm:$0xff pattern:$0x75316420]  ;;  %v45_v8 = vld.sshfl [vmem:[#allocation1 + $0x8] sm:$0xff pattern:$0x75316420] }
  0x1a   :  { %56 = vst [vmem:[#allocation1 + $0x1] ss:$2 sm:$0xff] %v393_v6  ;;  %v437_v17 = vpack.i.bf16 %v45_v8, %v44_v7  ;;  %v251_v8 = vld [vmem:[%s638_s4] sm:$0xff] }
  0x21   :  { %v560_v10 = vld.sshfl [vmem:[#allocation1] sm:$0xff pattern:$0x75316420]  ;;  %v562_v11 = vld.sshfl [vmem:[#allocation1 + $0x8] sm:$0xff pattern:$0x75316420] }
  0x22   :  { %62 = vst [vmem:[#allocation1] ss:$2 sm:$0xff] %v394_v9 }
  0x29   :  { %v564_v12 = vld.sshfl [vmem:[#allocation1] sm:$0xff pattern:$0x75316420]  ;;  %v64_v13 = vld.sshfl [vmem:[#allocation1 + $0x8] sm:$0xff pattern:$0x75316420] }
  0x2a   :  { %68 = vst [vmem:[#allocation1 + $0x1] ss:$2 sm:$0xff] %v393_v6 }
  0x31   :  { %v69_v14 = vld.sshfl [vmem:[#allocation1] sm:$0xff pattern:$0x75316420]  ;;  %v70_v15 = vld.sshfl [vmem:[#allocation1 + $0x8] sm:$0xff pattern:$0x75316420] }
  0x32   :  { %78 = vst [vmem:[#allocation1] ss:$2 sm:$0xff] %v23_v0  ;;  %v432_v16 = vpack.i.bf16 %v70_v15, %v69_v14 }
  0x34   :  { %433 = vrot.lane.b32.xlu2 %v432_v16, %s484_s29 }
  0x39   :  { %v79_v18 = vld.sshfl [vmem:[#allocation1] sm:$0xff pattern:$0x75316420]  ;;  %v80_v19 = vld.sshfl [vmem:[#allocation1 + $0x8] sm:$0xff pattern:$0x75316420] }
  0x3a   :  { %v422_v20 = vpack.i.bf16 %v80_v19, %v79_v18  ;;  %90 = vst [vmem:[#allocation1 + $0x1] ss:$2 sm:$0xff] %v392_v1 }
  0x3c   :  { %423 = vrot.lane.b32.xlu1 %v422_v20, %s485_s0  ;;  %438 = vrot.lane.b32.xlu2 %v437_v17, %s484_s29 }
  0x41   :  { %v91_v21 = vld.sshfl [vmem:[#allocation1] sm:$0xff pattern:$0x75316420]  ;;  %v92_v22 = vld.sshfl [vmem:[#allocation1 + $0x8] sm:$0xff pattern:$0x75316420] }
  0x42   :  { %v427_v23 = vpack.i.bf16 %v92_v22, %v91_v21  ;;  %100 = vst [vmem:[#allocation1] ss:$2 sm:$0xff] %v23_v0  ;;  %v181_v0 = vperm.slane %v179_v57, 0 }
  0x44   :  { %428 = vrot.lane.b32.xlu1 %v427_v23, %s485_s0 }
  0x49   :  { %v101_v24 = vld.sshfl [vmem:[#allocation1] sm:$0xff pattern:$0x75316420]  ;;  %v102_v25 = vld.sshfl [vmem:[#allocation1 + $0x8] sm:$0xff pattern:$0x75316420] }
  0x4a   :  { %103 = vrot.lane.b32.xlu0 %v101_v24, %s486_s30 }
  0x52   :  { %105 = vrot.lane.b32.xlu0 %v102_v25, %s486_s30 }
  0x5a   :  { %122 = vperm.xlu0 %442, %v119_v26  }
  0x8e   :  { %v434_v29 = vpop.permute.xlu2 %433 }
  0x8f   :  { %v436_v37 = vunpack.i.h.bf16 %v434_v29  ;;  %v435_v38 = vunpack.i.l.bf16 %v434_v29 }
  0x91   :  { %v75_v46 = vsel %vm50_vm3, %v435_v38, %v436_v37  ;;  %v115_v49 = vsel %vm109_vm2, %v64_v13, %v436_v37 }
  0x92   :  { %v114_v51 = vsel %vm109_vm2, %v564_v12, %v75_v46 }
  0x96   :  { %v439_v32 = vpop.permute.xlu2 %438 }
  0x97   :  { %v441_v39 = vunpack.i.h.bf16 %v439_v32  ;;  %v440_v40 = vunpack.i.l.bf16 %v439_v32 }
  0x99   :  { %v51_v47 = vsel %vm50_vm3, %v440_v40, %v441_v39  ;;  %v113_v50 = vsel %vm109_vm2, %v441_v39, %v562_v11  ;;  %v250_v40 = vld [vmem:[%s639_s3] sm:$0xff]  ;;  %s494_s3 = smov 77  }
  0x9a   :  { %v112_v52 = vsel %vm109_vm2, %v51_v47, %v560_v10 }
  0xae   :  { %v424_v28 = vpop.permute.xlu1 %423 }
  0xaf   :  { %v426_v33 = vunpack.i.h.bf16 %v424_v28  ;;  %v425_v34 = vunpack.i.l.bf16 %v424_v28 }
  0xb1   :  { %v86_v42 = vsel %vm85_vm0, %v425_v34, %v426_v33 }
  0xb6   :  { %v429_v31 = vpop.permute.xlu1 %428 }
  0xb7   :  { %v431_v35 = vunpack.i.h.bf16 %v429_v31  ;;  %v430_v36 = vunpack.i.l.bf16 %v429_v31 }
  0xb9   :  { %v97_v43 = vsel %vm85_vm0, %v430_v36, %v431_v35  ;;  %v117_v45 = vsel %vm109_vm2, %v426_v33, %v431_v35 }
  0xba   :  { %v116_v48 = vsel %vm109_vm2, %v86_v42, %v97_v43 }
  0xbc   :  { %v104_v30 = vpop.permute.xlu0 %103 }
  0xc4   :  { %v106_v41 = vpop.permute.xlu0 %105 }
  0xc5   :  { %397 = vmatpush.msk.msra.mxu1 %vm109_vm2, %v106_v41  ;;  %v108_v44 = vsel %vm107_vm1, %v104_v30, %v106_v41 }
  0xc6   :  { %395 = vmatpush.msk.msra.mxu0 %vm109_vm2, %v108_v44  ;;  %vm364_vm2 = vcmask 261120  }
  0xc7   :  { %165 = vmatpush.msra.mxu1 %v117_v45 }
  0xc8   :  { %145 = vmatpush.msra.mxu0 %v116_v48 }
  0xc9   :  { %166 = vmatpush.msra.mxu1 %v115_v49 }
  0xca   :  { %146 = vmatpush.msra.mxu0 %v114_v51 }
  0xcb   :  { %167 = vmatpush.msra.mxu1 %v113_v50 }
  0xcc   :  { %147 = vmatpush.msra.mxu0 %v112_v52  ;;  %v123_v56 = vpop.permute.xlu0 %122 }
  0xcd   :  { %168 = vmatpush.msra.mxu1 %v111_v53 }
  0xce   :  { %148 = vmatpush.msra.mxu0 %v110_v54  ;;  %398 = vmatmul.msk.f32.vlgmr.msra.gmra.mxu1 %vm125_vm4, %v118_v55 }
  0xcf   :  { %396 = vmatmul.msk.f32.vlgmr.msra.gmra.mxu0 %vm125_vm4, %v118_v55  ;;  %vm368_vm4 = vcmask 392192  }
 0x14b   :  { %v170_v58 = vpop.f32.mrf.mxu1 }
 0x14c   :  { %v171_v59 = vadd.f32 %v170_v58, %v123_v56  ;;  %v150_v60 = vpop.f32.mrf.mxu0 }
 0x14d   :  { %v151_v62 = vadd.f32 %v150_v60, %v123_v56 }
 0x14e   :  { %vm174_vm5 = vcmp.ge.f32.partialorder %v171_v59, 0.0  ;;  %v176_v63 = vmul.f32 0.2, %v171_v59 }
 0x14f   :  { %vm173_vm6 = vcmp.ge.f32.partialorder %v151_v62, 0.0  ;;  %v175_v1 = vmul.f32 0.2, %v151_v62 }
 0x150   :  { %v178_v2 = vsel %vm174_vm5, %v171_v59, %v176_v63  ;;  %vm370_vm5 = vcmask 457728  }
 0x151   :  { %v603_v3 = vmul.f32 %v182_v61, %v178_v2  ;;  %v177_v4 = vsel %vm173_vm6, %v151_v62, %v175_v1  ;;  %vm337_vm6 = vcmask 646144  }
 0x152   :  { %v605_v5 = vmul.f32 %v181_v0, %v177_v4 }
 0x154   :  { %v463_v6 = vpack.i.bf16 %v603_v3, %v605_v5 }
 0x156   :  { %464 = vrot.lane.b32.xlu0 %v463_v6, %s486_s30  ;;  %449 = vrot.lane.b32.xlu2 %v463_v6, %s488_s1 }
 0x157   :  { %444 = vrot.lane.b32.xlu1 %v463_v6, %s489_s5 }
 0x15e   :  { %479 = vrot.lane.b32.xlu0 %v463_v6, %s484_s29  ;;  %459 = vrot.lane.b32.xlu2 %v463_v6, %s490_s12 }
 0x15f   :  { %454 = vrot.lane.b32.xlu1 %v463_v6, %s491_s13 }
 0x166   :  { %474 = vrot.lane.b32.xlu2 %v463_v6, %s492_s14 }
 0x167   :  { %469 = vrot.lane.b32.xlu1 %v463_v6, %s485_s0 }
 0x16f   :  { %254 = vperm.xlu1 %483, %v251_v8  }
 0x1b0   :  { %v450_v7 = vpop.permute.xlu2 %449 }
 0x1b1   :  { %v451_v10 = vunpack.i.l.bf16 %v450_v7  ;;  %v452_v13 = vunpack.i.h.bf16 %v450_v7 }
 0x1b3   :  { %v239_v16 = vsel %vm238_vm8, %v451_v10, %v452_v13  ;;  %vm375_vm8 = vcmask 654336  }
 0x1b8   :  { %v460_v15 = vpop.permute.xlu2 %459 }
 0x1b9   :  { %v461_v19 = vunpack.i.l.bf16 %v460_v15  ;;  %v462_v22 = vunpack.i.h.bf16 %v460_v15 }
 0x1bb   :  { %v223_v26 = vsel %vm222_vm10, %v461_v19, %v462_v22  ;;  %vm379_vm10 = vcmask 785408  }
 0x1c0   :  { %v475_v27 = vpop.permute.xlu2 %474 }
 0x1c1   :  { %v476_v31 = vunpack.i.l.bf16 %v475_v27  ;;  %v477_v34 = vunpack.i.h.bf16 %v475_v27 }
 0x1c3   :  { %v201_v38 = vsel %vm200_vm11, %v476_v31, %v477_v34  ;;  %vm381_vm11 = vcmask 850944  }
 0x1c8   :  { %v465_v17 = vpop.permute.xlu0 %464 }
 0x1c9   :  { %v445_v9 = vpop.permute.xlu1 %444  ;;  %v466_v23 = vunpack.i.l.bf16 %v465_v17  ;;  %v467_v25 = vunpack.i.h.bf16 %v465_v17 }
 0x1ca   :  { %v446_v11 = vunpack.i.l.bf16 %v445_v9  ;;  %v447_v12 = vunpack.i.h.bf16 %v445_v9 }
 0x1cb   :  { %v215_v28 = vsel %vm107_vm1, %v466_v23, %v467_v25  ;;  %vm362_vm1 = vcmask 195584  }
 0x1cc   :  { %288 = vmatpush.msra.mxu3 %v447_v12  ;;  %v247_v14 = vsel %vm246_vm7, %v446_v11, %v447_v12  ;;  %vm372_vm7 = vcmask 523264  }
 0x1cd   :  { %268 = vmatpush.msra.mxu2 %v247_v14 }
 0x1ce   :  { %289 = vmatpush.msra.mxu3 %v452_v13 }
 0x1cf   :  { %269 = vmatpush.msra.mxu2 %v239_v16 }
 0x1d0   :  { %v480_v29 = vpop.permute.xlu0 %479 }
 0x1d1   :  { %v455_v18 = vpop.permute.xlu1 %454  ;;  %v481_v35 = vunpack.i.l.bf16 %v480_v29  ;;  %v482_v37 = vunpack.i.h.bf16 %v480_v29 }
 0x1d2   :  { %v456_v20 = vunpack.i.l.bf16 %v455_v18  ;;  %v457_v21 = vunpack.i.h.bf16 %v455_v18 }
 0x1d3   :  { %v193_v39 = vsel %vm50_vm3, %v481_v35, %v482_v37  ;;  %vm366_vm3 = vcmask 326656  }
 0x1d4   :  { %290 = vmatpush.msra.mxu3 %v457_v21  ;;  %v231_v24 = vsel %vm230_vm9, %v456_v20, %v457_v21  ;;  %vm377_vm9 = vcmask 719872  }
 0x1d5   :  { %270 = vmatpush.msra.mxu2 %v231_v24 }
 0x1d6   :  { %291 = vmatpush.msra.mxu3 %v462_v22 }
 0x1d7   :  { %271 = vmatpush.msra.mxu2 %v223_v26 }
 0x1d8   :  { %292 = vmatpush.msra.mxu3 %v467_v25 }
 0x1d9   :  { %v470_v30 = vpop.permute.xlu1 %469  ;;  %272 = vmatpush.msra.mxu2 %v215_v28 }
 0x1da   :  { %v471_v32 = vunpack.i.l.bf16 %v470_v30  ;;  %v472_v33 = vunpack.i.h.bf16 %v470_v30 }
 0x1dc   :  { %293 = vmatpush.msra.mxu3 %v472_v33  ;;  %v208_v36 = vsel %vm85_vm0, %v471_v32, %v472_v33  ;;  %vm360_vm0 = vcmask 130048  }
 0x1dd   :  { %273 = vmatpush.msra.mxu2 %v208_v36 }
 0x1de   :  { %294 = vmatpush.msra.mxu3 %v477_v34 }
 0x1df   :  { %274 = vmatpush.msra.mxu2 %v201_v38 }
 0x1e0   :  { %295 = vmatpush.msra.mxu3 %v482_v37 }
 0x1e1   :  { %275 = vmatpush.msra.mxu2 %v193_v39  ;;  %v255_v41 = vpop.permute.xlu1 %254 }
 0x1e2   :  { %296 = vmatpush.msra.mxu3 %v603_v3 }
 0x1e3   :  { %276 = vmatpush.msra.mxu2 %v605_v5  ;;  %400 = vmatmul.msk.f32.vlgmr.msra.gmra.mxu3 %vm257_vm12, %v250_v40 }
 0x1e4   :  { %399 = vmatmul.msk.f32.vlgmr.msra.gmra.mxu2 %vm257_vm12, %v250_v40 }
 0x266   :  { %v298_v42 = vpop.f32.mrf.mxu3 }
 0x267   :  { %v299_v43 = vadd.f32 %v298_v42, %v255_v41  ;;  %v278_v44 = vpop.f32.mrf.mxu2 }
 0x268   :  { %v279_v47 = vadd.f32 %v278_v44, %v255_v41 }
 0x269   :  { %vm302_vm13 = vcmp.ge.f32.partialorder %v299_v43, 0.0  ;;  %v304_v45 = vmul.f32 0.2, %v299_v43 }
 0x26a   :  { %v303_v48 = vmul.f32 0.2, %v279_v47  ;;  %vm301_vm14 = vcmp.ge.f32.partialorder %v279_v47, 0.0 }
 0x26b   :  { %v306_v46 = vsel %vm302_vm13, %v299_v43, %v304_v45  ;;  %vm383_vm13 = vcmask 916480  }
 0x26c   :  { %343 = vrot.lane.b32.xlu1 %v306_v46, %s493_s18  ;;  %340 = vrot.lane.b32.xlu0 %v306_v46, %s494_s3  ;;  %v305_v49 = vsel %vm301_vm14, %v279_v47, %v303_v48  ;;  %vm385_vm14 = vcmask 982016  }
 0x26d   :  { %335 = vrot.lane.b32.xlu2 %v306_v46, %s495_s19 }
 0x274   :  { %314 = vrot.lane.b32.xlu1 %v305_v49, %s496_s20  ;;  %311 = vrot.lane.b32.xlu0 %v305_v49, %s497_s21 }
 0x275   :  { %346 = vrot.lane.b32.xlu2 %v306_v46, %s498_s22 }
 0x27c   :  { %323 = vrot.lane.b32.xlu1 %v305_v49, %s490_s12  ;;  %320 = vrot.lane.b32.xlu0 %v305_v49, %s485_s0 }
 0x27d   :  { %308 = vrot.lane.b32.xlu2 %v305_v49, %s492_s14 }
 0x284   :  { %333 = vrot.lane.b32.xlu1 %v305_v49, %s495_s19  ;;  %329 = vrot.lane.b32.xlu0 %v305_v49, %s499_s23 }
 0x285   :  { %317 = vrot.lane.b32.xlu2 %v305_v49, %s500_s24 }
 0x28c   :  { %352 = vrot.lane.b32.xlu1 %v306_v46, %s501_s25  ;;  %349 = vrot.lane.b32.xlu0 %v306_v46, %s502_s26 }
 0x28d   :  { %326 = vrot.lane.b32.xlu2 %v305_v49, %s503_s27 }
 0x295   :  { %355 = vrot.lane.b32.xlu2 %v306_v46, %s504_s28 }
 0x2c7   :  { %v336_v50 = vpop.permute.xlu2 %335 }
 0x2cf   :  { %v347_v51 = vpop.permute.xlu2 %346 }
 0x2d7   :  { %v309_v54 = vpop.permute.xlu2 %308 }
 0x2d8   :  { %v359_v57 = vsel %vm358_vm15, %v305_v49, %v309_v54 }
 0x2de   :  { %v344_v52 = vpop.permute.xlu1 %343  ;;  %v341_v53 = vpop.permute.xlu0 %340 }
 0x2df   :  { %v318_v59 = vpop.permute.xlu2 %317 }
 0x2e6   :  { %v315_v55 = vpop.permute.xlu1 %314  ;;  %v312_v56 = vpop.permute.xlu0 %311 }
 0x2e7   :  { %v361_v58 = vsel %vm360_vm0, %v359_v57, %v312_v56  ;;  %v327_v2 = vpop.permute.xlu2 %326 }
 0x2e8   :  { %v363_v60 = vsel %vm362_vm1, %v361_v58, %v315_v55 }
 0x2e9   :  { %v365_v63 = vsel %vm364_vm2, %v363_v60, %v318_v59 }
 0x2ee   :  { %v324_v61 = vpop.permute.xlu1 %323  ;;  %v321_v62 = vpop.permute.xlu0 %320 }
 0x2ef   :  { %v367_v0 = vsel %vm366_vm3, %v365_v63, %v321_v62  ;;  %v356_v15 = vpop.permute.xlu2 %355 }
 0x2f0   :  { %v369_v1 = vsel %vm368_vm4, %v367_v0, %v324_v61 }
 0x2f1   :  { %v371_v5 = vsel %vm370_vm5, %v369_v1, %v327_v2 }
 0x2f6   :  { %v334_v3 = vpop.permute.xlu1 %333  ;;  %v330_v4 = vpop.permute.xlu0 %329 }
 0x2f7   :  { %v338_v6 = vsel %vm337_vm6, %v334_v3, %v336_v50  ;;  %v373_v7 = vsel %vm372_vm7, %v371_v5, %v330_v4 }
 0x2f8   :  { %v374_v8 = vsel %vm257_vm12, %v373_v7, %v338_v6 }
 0x2f9   :  { %v376_v9 = vsel %vm375_vm8, %v374_v8, %v341_v53 }
 0x2fa   :  { %v378_v10 = vsel %vm377_vm9, %v376_v9, %v344_v52 }
 0x2fb   :  { %v380_v13 = vsel %vm379_vm10, %v378_v10, %v347_v51 }
 0x2fe   :  { %v353_v11 = vpop.permute.xlu1 %352  ;;  %v350_v12 = vpop.permute.xlu0 %349 }
 0x2ff   :  { %v382_v14 = vsel %vm381_vm11, %v380_v13, %v350_v12 }
 0x300   :  { %v384_v16 = vsel %vm383_vm13, %v382_v14, %v353_v11 }
 0x301   :  { %v386_v17 = vsel %vm385_vm14, %v384_v16, %v356_v15 }
 0x302   :  { %387 = vst [vmem:[%s640_s6] sm:$0xff] %v386_v17 }

</bundles_post_ra>
